<compile_context>
chip_gen: v7x
topology: tpu7x:2x2x1
jax: 0.10.0
libtpu: 0.0.40
codegen_flags: <defaults>
</compile_context>

<pallas_src>
import jax
import jax.numpy as jnp
from jax.experimental import pallas as pl
from jax.experimental.pallas import tpu as pltpu


def _round_up(a, m):
    return ((a + m - 1) // m) * m


def _logits_lse_kernel(x_ref, w_ref, b_ref, logits_ref, lse_ref, m_sc, l_sc):
    """Grid = (row_tiles, vocab_tiles); vocab axis last ('arbitrary').

    x_ref:      (tm, d_model)
    w_ref:      (d_model, tn)     -- streamed per vocab tile
    b_ref:      (1, tn)
    logits_ref: (tm, tn)  f32     -- raw logits for this vocab tile
    lse_ref:    (tm, 1)   f32     -- per-row logsumexp, finalized at last tile
    m_sc, l_sc: (tm, 1)   f32 VMEM scratch (running max / running sum)
    """
    j = pl.program_id(1)

    @pl.when(j == 0)
    def _():
        m_sc[...] = jnp.full_like(m_sc, -jnp.inf)
        l_sc[...] = jnp.zeros_like(l_sc)

    # MXU matmul with f32 accumulate (operands stay in their input dtype,
    # e.g. bf16 inputs get the fast bf16 MXU path automatically).
    logits = jnp.dot(x_ref[...], w_ref[...],
                     preferred_element_type=jnp.float32) + b_ref[...]
    logits_ref[...] = logits.astype(logits_ref.dtype)

    # Online logsumexp update.
    m_prev = m_sc[...]
    m_new = jnp.maximum(m_prev, jnp.max(logits, axis=-1, keepdims=True))
    l_sc[...] = (l_sc[...] * jnp.exp(m_prev - m_new)
                 + jnp.sum(jnp.exp(logits - m_new), axis=-1, keepdims=True))
    m_sc[...] = m_new

    @pl.when(j == pl.num_programs(1) - 1)
    def _():
        lse_ref[...] = m_sc[...] + jnp.log(l_sc[...])


def _normalize_kernel(logits_ref, lse_ref, o_ref):
    """o = logits - lse (broadcast over the vocab tile), cast to output dtype."""
    o_ref[...] = (logits_ref[...] - lse_ref[...]).astype(o_ref.dtype)


def generator_forward(x, w, b, *, tm=256, tn=512, out_dtype=None):
    """x: (..., d_model); w: (d_model, vocab); b: (vocab,). Returns (..., vocab)."""
    d_model, vocab = w.shape
    lead = x.shape[:-1]
    out_dtype = out_dtype if out_dtype is not None else x.dtype

    x2 = x.reshape(-1, d_model)
    M = x2.shape[0]

    # Row tile: multiple of 16 (safe for bf16 sublane packing), capped at tm.
    tm_eff = min(tm, _round_up(M, 16))
    M_pad = _round_up(M, tm_eff)
    if M_pad != M:
        x2 = jnp.pad(x2, ((0, M_pad - M), (0, 0)))

    # Vocab tile: multiple of 128 that divides vocab, else one full-width tile.
    if vocab % 128 == 0:
        tn_eff = min(tn, vocab)
        while vocab % tn_eff != 0:
            tn_eff -= 128
    else:
        tn_eff = vocab

    b2 = b.reshape(1, vocab)
    grid_rows = M_pad // tm_eff
    grid_cols = vocab // tn_eff

    itemsize = jnp.dtype(x2.dtype).itemsize
    cost1 = pl.CostEstimate(
        flops=2 * M_pad * d_model * vocab,
        transcendentals=M_pad * vocab,
        bytes_accessed=(M_pad * d_model * itemsize
                        + d_model * vocab * jnp.dtype(w.dtype).itemsize
                        + M_pad * vocab * 4 + M_pad * 4),
    )

    logits, lse = pl.pallas_call(
        _logits_lse_kernel,
        out_shape=(jax.ShapeDtypeStruct((M_pad, vocab), jnp.float32),
                   jax.ShapeDtypeStruct((M_pad, 1), jnp.float32)),
        grid_spec=pltpu.PrefetchScalarGridSpec(
            num_scalar_prefetch=0,
            grid=(grid_rows, grid_cols),
            in_specs=[
                pl.BlockSpec((tm_eff, d_model), lambda i, j: (i, 0)),
                pl.BlockSpec((d_model, tn_eff), lambda i, j: (0, j)),
                pl.BlockSpec((1, tn_eff), lambda i, j: (0, j)),
            ],
            out_specs=(
                pl.BlockSpec((tm_eff, tn_eff), lambda i, j: (i, j)),
                pl.BlockSpec((tm_eff, 1), lambda i, j: (i, 0)),
            ),
            scratch_shapes=[pltpu.VMEM((tm_eff, 1), jnp.float32),
                            pltpu.VMEM((tm_eff, 1), jnp.float32)],
        ),
        compiler_params=pltpu.CompilerParams(
            dimension_semantics=("parallel", "arbitrary"),
            vmem_limit_bytes=48 * 1024 * 1024,  # fits v7x's 64 MiB VMEM
        ),
        cost_estimate=cost1,
    )(x2, w, b2)

    out = pl.pallas_call(
        _normalize_kernel,
        out_shape=jax.ShapeDtypeStruct((M_pad, vocab), out_dtype),
        grid_spec=pltpu.PrefetchScalarGridSpec(
            num_scalar_prefetch=0,
            grid=(grid_rows, grid_cols),
            in_specs=[
                pl.BlockSpec((tm_eff, tn_eff), lambda i, j: (i, j)),
                pl.BlockSpec((tm_eff, 1), lambda i, j: (i, 0)),
            ],
            out_specs=pl.BlockSpec((tm_eff, tn_eff), lambda i, j: (i, j)),
        ),
        compiler_params=pltpu.CompilerParams(
            dimension_semantics=("parallel", "parallel"),
            vmem_limit_bytes=48 * 1024 * 1024,
        ),
    )(logits, lse)

    if M_pad != M:
        out = out[:M]
    return out.reshape(*lead, vocab)


if __name__ == "__main__":
    # Small shapes consistent with the module: batch=2, seq=8, d_model=32, vocab=128
    batch, seq, d_model, vocab = 2, 8, 32, 128

    key = jax.random.PRNGKey(0)
    kx, kw, kb = jax.random.split(key, 3)

    x = jax.random.normal(kx, (batch, seq, d_model), dtype=jnp.float32)
    # nn.Linear(d_model, vocab) params, stored transposed for the kernel:
    # W is (d_model, vocab), b is (vocab,).
    w = jax.random.normal(kw, (d_model, vocab), dtype=jnp.float32) * 0.05
    b = jax.random.normal(kb, (vocab,), dtype=jnp.float32) * 0.05

    out = generator_forward(x, w, b)
    jax.block_until_ready(out)

    # Reference: F.log_softmax(x @ W + b, dim=-1) in plain JAX.
    ref = jax.nn.log_softmax(x @ w + b, axis=-1)
    assert out.shape == (batch, seq, vocab)
    assert jnp.allclose(out, ref, atol=1e-5, rtol=1e-5)

    # Ragged-row path (batch*seq not a multiple of the row tile): exercises the
    # zero-pad + slice handling in the wrapper.
    x_rag = jax.random.normal(kx, (batch, seq - 1, d_model), dtype=jnp.float32)
    out_rag = generator_forward(x_rag, w, b)
    jax.block_until_ready(out_rag)
    ref_rag = jax.nn.log_softmax(x_rag @ w + b, axis=-1)
    assert out_rag.shape == (batch, seq - 1, vocab)
    assert jnp.allclose(out_rag, ref_rag, atol=1e-5, rtol=1e-5)

    print("KERNEL_OK")
</pallas_src>

<mosaic_0001>
module attributes {stable_mosaic.version = 11 : i64} {
  func.func @_logits_lse_kernel(%arg0: i32, %arg1: i32, %arg2: memref<16x32xf32, #tpu.memory_space<vmem>>, %arg3: memref<32x128xf32, #tpu.memory_space<vmem>>, %arg4: memref<1x128xf32, #tpu.memory_space<vmem>>, %arg5: memref<16x128xf32, #tpu.memory_space<vmem>>, %arg6: memref<16x1xf32, #tpu.memory_space<vmem>>, %arg7: memref<16x1xf32, #tpu.memory_space<vmem>>, %arg8: memref<16x1xf32, #tpu.memory_space<vmem>>) attributes {dimension_semantics = [#tpu.dimension_semantics<parallel>, #tpu.dimension_semantics<arbitrary>], iteration_bounds = array<i64: 1, 1>, scalar_prefetch = 0 : i64, scratch_operands = 2 : i64, tpu.core_type = #tpu.core_type<tc>, window_params = [{transform_indices = @transform_0, window_bounds = array<i64: 16, 32>}, {transform_indices = @transform_1, window_bounds = array<i64: 32, 128>}, {transform_indices = @transform_2, window_bounds = array<i64: 1, 128>}, {transform_indices = @transform_3, window_bounds = array<i64: 16, 128>}, {transform_indices = @transform_4, window_bounds = array<i64: 16, 1>}]} {
    %c0_i32 = arith.constant 0 : i32
    %0 = arith.cmpi eq, %arg1, %c0_i32 : i32
    %1 = arith.extui %0 : i1 to i32
    %c0_i32_0 = arith.constant 0 : i32
    %2 = arith.cmpi ne, %1, %c0_i32_0 : i32
    scf.if %2 {
      %cst_20 = arith.constant 0xFF800000 : f32
      %29 = vector.broadcast %cst_20 : f32 to vector<16x1xf32>
      %c0_21 = arith.constant 0 : index
      %c0_22 = arith.constant 0 : index
      %30 = vector.load %arg7[%c0_21, %c0_22] : memref<16x1xf32, #tpu.memory_space<vmem>>, vector<16x1xf32>
      tpu.vector_store %arg7[%c0_21, %c0_22], %29 {strides = array<i32>} : memref<16x1xf32, #tpu.memory_space<vmem>>, vector<16x1xf32>,
      %cst_23 = arith.constant 0.000000e+00 : f32
      %31 = vector.broadcast %cst_23 : f32 to vector<16x1xf32>
      %c0_24 = arith.constant 0 : index
      %c0_25 = arith.constant 0 : index
      %32 = vector.load %arg8[%c0_24, %c0_25] : memref<16x1xf32, #tpu.memory_space<vmem>>, vector<16x1xf32>
      tpu.vector_store %arg8[%c0_24, %c0_25], %31 {strides = array<i32>} : memref<16x1xf32, #tpu.memory_space<vmem>>, vector<16x1xf32>,
    } else {
    }
    %c0 = arith.constant 0 : index
    %c0_1 = arith.constant 0 : index
    %3 = vector.load %arg2[%c0, %c0_1] : memref<16x32xf32, #tpu.memory_space<vmem>>, vector<16x32xf32>
    %c0_2 = arith.constant 0 : index
    %c0_3 = arith.constant 0 : index
    %4 = vector.load %arg3[%c0_2, %c0_3] : memref<32x128xf32, #tpu.memory_space<vmem>>, vector<32x128xf32>
    %cst = arith.constant dense<0.000000e+00> : vector<16x128xf32>
    %5 = tpu.matmul %3, %4, %cst {dimension_numbers = #tpu.dot_dimension_numbers<[1], [0], [0], [1], [0, 0, 1, 1], [], []>} : vector<16x32xf32>, vector<32x128xf32>, vector<16x128xf32> -> vector<16x128xf32>
    %c0_4 = arith.constant 0 : index
    %c0_5 = arith.constant 0 : index
    %6 = vector.load %arg4[%c0_4, %c0_5] : memref<1x128xf32, #tpu.memory_space<vmem>>, vector<1x128xf32>
    %7 = vector.broadcast %6 : vector<1x128xf32> to vector<16x128xf32>
    %8 = arith.addf %5, %7 : vector<16x128xf32>
    %c0_6 = arith.constant 0 : index
    %c0_7 = arith.constant 0 : index
    %9 = vector.load %arg5[%c0_6, %c0_7] : memref<16x128xf32, #tpu.memory_space<vmem>>, vector<16x128xf32>
    tpu.vector_store %arg5[%c0_6, %c0_7], %8 {strides = array<i32>} : memref<16x128xf32, #tpu.memory_space<vmem>>, vector<16x128xf32>,
    %c0_8 = arith.constant 0 : index
    %c0_9 = arith.constant 0 : index
    %10 = vector.load %arg7[%c0_8, %c0_9] : memref<16x1xf32, #tpu.memory_space<vmem>>, vector<16x1xf32>
    %cst_10 = arith.constant dense<0xFF800000> : vector<16xf32>
    %11 = vector.multi_reduction <maximumf>, %8, %cst_10 [1] : vector<16x128xf32> to vector<16xf32>
    %12 = vector.shape_cast %11 : vector<16xf32> to vector<16x1xf32>
    %13 = arith.maximumf %10, %12 : vector<16x1xf32>
    %c0_11 = arith.constant 0 : index
    %c0_12 = arith.constant 0 : index
    %14 = vector.load %arg8[%c0_11, %c0_12] : memref<16x1xf32, #tpu.memory_space<vmem>>, vector<16x1xf32>
    %15 = arith.subf %10, %13 : vector<16x1xf32>
    %16 = math.exp %15 : vector<16x1xf32>
    %17 = arith.mulf %14, %16 : vector<16x1xf32>
    %18 = vector.broadcast %13 : vector<16x1xf32> to vector<16x128xf32>
    %19 = arith.subf %8, %18 : vector<16x128xf32>
    %20 = math.exp %19 : vector<16x128xf32>
    %cst_13 = arith.constant dense<0.000000e+00> : vector<16xf32>
    %21 = vector.multi_reduction <add>, %20, %cst_13 [1] : vector<16x128xf32> to vector<16xf32>
    %22 = vector.shape_cast %21 : vector<16xf32> to vector<16x1xf32>
    %23 = arith.addf %17, %22 : vector<16x1xf32>
    %c0_14 = arith.constant 0 : index
    %c0_15 = arith.constant 0 : index
    %24 = vector.load %arg8[%c0_14, %c0_15] : memref<16x1xf32, #tpu.memory_space<vmem>>, vector<16x1xf32>
    tpu.vector_store %arg8[%c0_14, %c0_15], %23 {strides = array<i32>} : memref<16x1xf32, #tpu.memory_space<vmem>>, vector<16x1xf32>,
    %c0_16 = arith.constant 0 : index
    %c0_17 = arith.constant 0 : index
    %25 = vector.load %arg7[%c0_16, %c0_17] : memref<16x1xf32, #tpu.memory_space<vmem>>, vector<16x1xf32>
    tpu.vector_store %arg7[%c0_16, %c0_17], %13 {strides = array<i32>} : memref<16x1xf32, #tpu.memory_space<vmem>>, vector<16x1xf32>,
    %c0_i32_18 = arith.constant 0 : i32
    %26 = arith.cmpi eq, %arg1, %c0_i32_18 : i32
    %27 = arith.extui %26 : i1 to i32
    %c0_i32_19 = arith.constant 0 : i32
    %28 = arith.cmpi ne, %27, %c0_i32_19 : i32
    scf.if %28 {
      %c0_20 = arith.constant 0 : index
      %c0_21 = arith.constant 0 : index
      %29 = vector.load %arg7[%c0_20, %c0_21] : memref<16x1xf32, #tpu.memory_space<vmem>>, vector<16x1xf32>
      %c0_22 = arith.constant 0 : index
      %c0_23 = arith.constant 0 : index
      %30 = vector.load %arg8[%c0_22, %c0_23] : memref<16x1xf32, #tpu.memory_space<vmem>>, vector<16x1xf32>
      %31 = math.log %30 : vector<16x1xf32>
      %32 = arith.addf %29, %31 : vector<16x1xf32>
      %c0_24 = arith.constant 0 : index
      %c0_25 = arith.constant 0 : index
      %33 = vector.load %arg6[%c0_24, %c0_25] : memref<16x1xf32, #tpu.memory_space<vmem>>, vector<16x1xf32>
      tpu.vector_store %arg6[%c0_24, %c0_25], %32 {strides = array<i32>} : memref<16x1xf32, #tpu.memory_space<vmem>>, vector<16x1xf32>,
    } else {
    }
    return
  }
  func.func @transform_0(%arg0: i32, %arg1: i32) -> (i32, i32) {
    %c0_i32 = arith.constant 0 : i32
    %c0_i32_0 = arith.constant 0 : i32
    return %arg0, %c0_i32 : i32, i32
  }
  func.func @transform_1(%arg0: i32, %arg1: i32) -> (i32, i32) {
    %c0_i32 = arith.constant 0 : i32
    %c0_i32_0 = arith.constant 0 : i32
    return %c0_i32, %arg1 : i32, i32
  }
  func.func @transform_2(%arg0: i32, %arg1: i32) -> (i32, i32) {
    %c0_i32 = arith.constant 0 : i32
    %c0_i32_0 = arith.constant 0 : i32
    return %c0_i32, %arg1 : i32, i32
  }
  func.func @transform_3(%arg0: i32, %arg1: i32) -> (i32, i32) {
    %c0_i32 = arith.constant 0 : i32
    return %arg0, %arg1 : i32, i32
  }
  func.func @transform_4(%arg0: i32, %arg1: i32) -> (i32, i32) {
    %c0_i32 = arith.constant 0 : i32
    %c0_i32_0 = arith.constant 0 : i32
    return %arg0, %c0_i32 : i32, i32
  }
}

</mosaic_0001>

<bundles_post_ra>
// kernel: tpu_custom_call.1
= control target key start
LH: loop header
LB: loop body
LE: loop exit
PB: predicated region body
PF: predicated region fallthrough
CT: control target
= control target key end

     0   :  { %10 = vsyncpa [#allocation5], 0  ;;  %s452_s0 = inlined_call_operand.hbm [shape: f32[16,32], index: 0, kind: input, shape index: {}]   ;;  %s453_s1 = inlined_call_operand.hbm [shape: f32[32,128], index: 1, kind: input, shape index: {}]   ;;  %s454_s2 = inlined_call_operand.vmem [shape: f32[1,128], index: 2, kind: input, shape index: {}]   ;;  %s455_s3 = inlined_call_operand.hbm [shape: f32[16,128], index: 3, kind: output, shape index: {0}]   ;;  %s456_s4 = inlined_call_operand.vmem [shape: f32[16,1], index: 4, kind: output, shape index: {1}]  }
   0x1   :  { %11 = vsyncpa [#allocation8], 0 }
   0x2   :  { %12 = vsyncpa [#allocation6], 0  ;;  %s355_s15 = smov [#allocation4]   ;;  %s283_s19 = scalar_lea.hbm %s452_s0, 256 }
   0x3   :  { %s18_s16 = sshll.u32 %s355_s15, 4  ;;  %p284_p0 = scmp.ne.s32.totalorder %s452_s0, %s283_s19  ;;  %s19_s16 = int_to_ptr.vmem [resolvable:$true] %s18_s16 }
   0x4   :  { %p287_p1 = scmp.lt.u32.totalorder %s283_s19, %s452_s0 }
   0x6   :  { %p289_p2 = pnand %p287_p1, %p284_p0 }
   0x8   :  { %292 = shalt.err (!%p289_p2)
}
   0x9   :  { %s293_s24 = scalar_lea.vmem %s19_s16, 256  ;;  %p298_p4 = scmp.lt.s32.totalorder %s19_s16, %s19_s16 }
   0xa   :  { %p294_p3 = scmp.ne.s32.totalorder %s19_s16, %s293_s24  ;;  %p299_p5 = scmp.lt.s32.totalorder %s293_s24, %s293_s24 }
   0xc   :  { %p300_p6 = por %p299_p5, %p298_p4 }
   0xe   :  { %p301_p7 = pnand %p300_p6, %p294_p3 }
  0x10   :  { %304 = shalt.err (!%p301_p7)
}
  0x11   :  { %s356_s25 = smov 128   ;;  %s357_s26 = smov 8  }
  0x12   :  { %24 = dma.hbm_to_vmem [thread:$0]  %s452_s0, 256, %s19_s16, [#allocation5], %s356_s25, %s356_s25, %s357_s26  }
  0x13   :  { %s358_s29 = smov [#allocation7]   ;;  %s305_s7 = scalar_lea.hbm %s453_s1, 512 }
  0x14   :  { %s30_s30 = sshll.u32 %s358_s29, 4  ;;  %p306_p8 = scmp.ne.s32.totalorder %s453_s1, %s305_s7  ;;  %s31_s30 = int_to_ptr.vmem [resolvable:$true] %s30_s30 }
  0x15   :  { %p309_p9 = scmp.lt.u32.totalorder %s305_s7, %s453_s1 }
  0x17   :  { %p311_p10 = pnand %p309_p9, %p306_p8 }
  0x19   :  { %314 = shalt.err (!%p311_p10)
}
  0x1a   :  { %s315_s12 = scalar_lea.vmem %s31_s30, 512  ;;  %p320_p12 = scmp.lt.s32.totalorder %s31_s30, %s31_s30 }
  0x1b   :  { %p316_p11 = scmp.ne.s32.totalorder %s31_s30, %s315_s12  ;;  %p321_p13 = scmp.lt.s32.totalorder %s315_s12, %s315_s12 }
  0x1d   :  { %p322_p0 = por %p321_p13, %p320_p12 }
  0x1f   :  { %p323_p1 = pnand %p322_p0, %p316_p11 }
  0x21   :  { %326 = shalt.err (!%p323_p1)
}
  0x22   :  { %36 = dma.hbm_to_vmem [thread:$0]  %s453_s1, 512, %s31_s30, [#allocation8], %s356_s25, %s356_s25, %s357_s26  }
  0x23   :  { %349 = dma.done.wait [#allocation5], 256  }
  0x24   :  { %350 = vsyncadd [#allocation5], 4294967040 }
  0x25   :  { %351 = dma.done.wait [#allocation8], 512  }
  0x26   :  { %352 = vsyncadd [#allocation8], 4294966784  ;;  %vm67_vm0 = vcmask 261120   ;;  %v56_v0 = vld [vmem:[#allocation7] sm:$0xff]  ;;  %v57_v1 = vld [vmem:[#allocation7 + $0x8] sm:$0xff]  ;;  %vm49_vm1 = vcmask 7168  }
  0x27   :  { %v58_v2 = vld [vmem:[#allocation7 + $0x10] sm:$0xff]  ;;  %v253_v3 = vpack.c.bf16 %v57_v1, %v56_v0  ;;  %v59_v4 = vld [vmem:[#allocation7 + $0x18] sm:$0xff]  ;;  %v359_v8 = vmov -inf   ;;  %v360_v14 = vmov 0   ;;  %v361_v15 = vmov 0.0  }
  0x28   :  { %v54_v5 = vld [vmem:[#allocation4] sm:$0xff]  ;;  %v257_v6 = vpack.c.bf16 %v59_v4, %v58_v2  ;;  %v55_v7 = vld [vmem:[#allocation4 + $0x8] sm:$0xff]  ;;  %50 = vst.msk [vmem:[#allocation2] sm:$0xff] %vm49_vm1, %v359_v8  ;;  %51 = vst.msk [vmem:[#allocation2 + $0x8] sm:$0xff] %vm49_vm1, %v359_v8  ;;  %269 = vset.pattern.permute.xlu1 %v360_v14  ;;  %270 = vset.pattern.permute.xlu0 %v360_v14 }
  0x29   :  { %250 = vmatprep.mubr.msk.f32.mxu0 %vm67_vm0, %v54_v5  ;;  %254 = vmatprep.subr.bf16.mxu0 %v253_v3  ;;  %v233_v9 = vld [vmem:[%s454_s2] ss:$0 sm:$0xff]  ;;  %52 = vst.msk [vmem:[#allocation3] sm:$0xff] %vm49_vm1, %v361_v15  ;;  %53 = vst.msk [vmem:[#allocation3 + $0x8] sm:$0xff] %vm49_vm1, %v361_v15  ;;  %s362_s2 = smov [#allocation9]  }
  0x2a   :  { %256 = vmatpush3.bf16.msra.mxu0 %v253_v3  ;;  %s216_s15 = sshll.u32 %s362_s2, 4  ;;  %s217_s15 = int_to_ptr.vmem [resolvable:$true] %s216_s15 }
  0x2b   :  { %258 = vmatprep.subr.bf16.mxu0 %v257_v6  ;;  %s327_s16 = scalar_lea.vmem %s217_s15, 256  ;;  %p332_p3 = scmp.lt.s32.totalorder %s217_s15, %s217_s15 }
  0x2c   :  { %p328_p2 = scmp.ne.s32.totalorder %s217_s15, %s327_s16  ;;  %p333_p4 = scmp.lt.s32.totalorder %s327_s16, %s327_s16 }
  0x2e   :  { %260 = vmatpush3.bf16.msra.mxu0 %v257_v6  ;;  %p334_p5 = por %p333_p4, %p332_p3 }
  0x2f   :  { %v151_v16 = vld [vmem:[#allocation2] sm:$0xff]  ;;  %v152_v19 = vld [vmem:[#allocation2 + $0x8] sm:$0xff] }
  0x30   :  { %p335_p6 = pnand %p334_p5, %p328_p2 }
  0x31   :  { %251 = vmatmul.mubr.msk.f32.vlgmr.msra.gmra.mrb[0].mxu0 %vm67_vm0, %v55_v7 }
 0x104   :  { %v252_v10 = vpop.f32.mrb[0].mxu0 }
 0x105   :  { %v146_v11 = vadd.f32 %v252_v10, %v233_v9  ;;  %v140_v12 = vpop.f32.mrb[1].mxu0 }
 0x106   :  { %v141_v13 = vadd.f32 %v233_v9, %v140_v12 }
 0x107   :  { %150 = vst [vmem:[#allocation9 + $0x8] sm:$0xff] %v146_v11 }
 0x108   :  { %149 = vst [vmem:[#allocation9] sm:$0xff] %v141_v13  ;;  %153 = vmax.xlane.f32.xlu0 %v141_v13 }
 0x10c   :  { %155 = vmax.xlane.f32.xlu0 %v146_v11 }
 0x195   :  { %v154_v17 = vpop.xlane.xlu0 %153 }
 0x196   :  { %v157_v18 = vmax.f32 %v151_v16, %v154_v17 }
 0x198   :  { %v161_v20 = vsub.f32 %v151_v16, %v157_v18  ;;  %194 = vst.msk [vmem:[#allocation2] sm:$0xff] %vm49_vm1, %v157_v18  ;;  %171 = vperm.xlu1 %269, %v157_v18  }
 0x199   :  { %v156_v21 = vpop.xlane.xlu0 %155 }
 0x19a   :  { %v158_v22 = vmax.f32 %v152_v19, %v156_v21 }
 0x19c   :  { %v162_v23 = vsub.f32 %v152_v19, %v158_v22  ;;  %195 = vst.msk [vmem:[#allocation2 + $0x8] sm:$0xff] %vm49_vm1, %v158_v22  ;;  %176 = vperm.xlu1 %269, %v158_v22  }
 0x217   :  { %v172_v24 = vpop.permute.xlu1 %171 }
 0x218   :  { %v179_v25 = vsub.f32 %v141_v13, %v172_v24 }
 0x21a   :  { %v181_v26 = vmul.f32 1.442695, %v179_v25 }
 0x21b   :  { %v177_v27 = vpop.permute.xlu1 %176 }
 0x21c   :  { %271 = vpow2.f32 %v181_v26  ;;  %v180_v28 = vsub.f32 %v146_v11, %v177_v27 }
 0x21e   :  { %v183_v29 = vmul.f32 1.442695, %v180_v28 }
 0x220   :  { %273 = vpow2.f32 %v183_v29 }
 0x226   :  { %v272_v30 = vpop.eup %271 }
 0x227   :  { %185 = vadd.xlane.f32.xlu0 %v272_v30 }
 0x22a   :  { %v274_v31 = vpop.eup %273 }
 0x22b   :  { %187 = vadd.xlane.f32.xlu1 %v274_v31 }
 0x22c   :  { %338 = shalt.err (!%p335_p6)
}
 0x22d   :  { %s339_s19 = scalar_lea.hbm %s455_s3, 256 }
 0x22e   :  { %p340_p7 = scmp.ne.s32.totalorder %s455_s3, %s339_s19  ;;  %p343_p8 = scmp.lt.u32.totalorder %s339_s19, %s455_s3 }
 0x230   :  { %p345_p9 = pnand %p343_p8, %p340_p7 }
 0x232   :  { %348 = shalt.err (!%p345_p9)
}
 0x233   :  { %222 = dma.vmem_to_hbm [thread:$0]  %s217_s15, 256, %s455_s3, [#allocation6], %s356_s25, %s356_s25, %s357_s26   ;;  %v163_v32 = vmul.f32 1.442695, %v161_v20  ;;  %v165_v33 = vmul.f32 1.442695, %v162_v23 }
 0x234   :  { %v159_v35 = vld [vmem:[#allocation3] sm:$0xff]  ;;  %v160_v39 = vld [vmem:[#allocation3 + $0x8] sm:$0xff]  ;;  %v199_v48 = vld [vmem:[#allocation2] sm:$0xff] }
 0x235   :  { %275 = vpow2.f32 %v163_v32  ;;  %v200_v52 = vld [vmem:[#allocation2 + $0x8] sm:$0xff] }
 0x236   :  { %277 = vpow2.f32 %v165_v33 }
 0x23f   :  { %v276_v34 = vpop.eup %275 }
 0x240   :  { %v167_v36 = vmul.f32 %v276_v34, %v159_v35  ;;  %v278_v37 = vpop.eup %277 }
 0x241   :  { %v168_v41 = vmul.f32 %v278_v37, %v160_v39 }
 0x2b4   :  { %v186_v38 = vpop.xlane.xlu0 %185 }
 0x2b5   :  { %v189_v40 = vadd.f32 %v186_v38, %v167_v36 }
 0x2b7   :  { %192 = vst.msk [vmem:[#allocation3] sm:$0xff] %vm49_vm1, %v189_v40 }
 0x2b8   :  { %v188_v42 = vpop.xlane.xlu1 %187 }
 0x2b9   :  { %v190_v43 = vadd.f32 %v188_v42, %v168_v41 }
 0x2bb   :  { %193 = vst.msk [vmem:[#allocation3 + $0x8] sm:$0xff] %vm49_vm1, %v190_v43 }
 0x2be   :  { %v201_v44 = vld [vmem:[#allocation3] sm:$0xff] }
 0x2bf   :  { %279 = vlog2.f32 %v201_v44 }
 0x2c2   :  { %v202_v45 = vld [vmem:[#allocation3 + $0x8] sm:$0xff] }
 0x2c3   :  { %281 = vlog2.f32 %v202_v45 }
 0x2c9   :  { %v280_v46 = vpop.eup %279 }
 0x2ca   :  { %v204_v47 = vmul.f32 0.6931472, %v280_v46 }
 0x2cc   :  { %v207_v49 = vadd.f32 %v204_v47, %v199_v48 }
 0x2cd   :  { %v282_v50 = vpop.eup %281 }
 0x2ce   :  { %209 = vst.msk [vmem:[%s456_s4] sm:$0xff] %vm49_vm1, %v207_v49  ;;  %v206_v51 = vmul.f32 0.6931472, %v282_v50 }
 0x2d0   :  { %v208_v53 = vadd.f32 %v206_v51, %v200_v52 }
 0x2d2   :  { %210 = vst.msk [vmem:[%s456_s4 + $0x8] sm:$0xff] %vm49_vm1, %v208_v53 }
 0x2d3   :  { %353 = dma.done.wait [#allocation6], 256  }
 0x2d4   :  { %354 = vsyncadd [#allocation6], 4294967040 }
 0x2d5   :  { %230 = vsyncpa [#allocation5], 1 }
 0x2d6   :  { %231 = vsyncpa [#allocation8], 1 }
 0x2d7   :  { %232 = vsyncpa [#allocation6], 1 }

</bundles_post_ra>
